<compile_context>
chip_gen: v5e
topology: v5e:2x2
jax: 0.10.0
libtpu: 0.0.40
codegen_flags: <defaults>
</compile_context>

<pallas_src>
import math
from functools import partial

import jax
import jax.numpy as jnp
from jax.experimental import pallas as pl
from jax.experimental.pallas import tpu as pltpu

LANE = 128


# ----------------------------- small helpers --------------------------------

def _round_up(x, m):
    return (x + m - 1) // m * m


def _pad_to(x, shape):
    return jnp.pad(x, [(0, t - s) for s, t in zip(x.shape, shape)])


def _layernorm_masked(x, dmask, d_real, eps=1e-5):
    """LayerNorm(weight=1, bias=0, eps=1e-5) over the first `d_real` lanes.

    `x` is [S, Dp] f32 with padded lanes guaranteed zero; `dmask` is [1, Dp]
    (1.0 on real lanes).  Output padded lanes are zero again.
    """
    inv_d = 1.0 / d_real
    mu = jnp.sum(x, axis=-1, keepdims=True) * inv_d
    diff = (x - mu) * dmask
    var = jnp.sum(diff * diff, axis=-1, keepdims=True) * inv_d
    return diff * jax.lax.rsqrt(var + eps)


# ----------------------------- fused kernel ---------------------------------

def fused_encoder_kernel(x_ref, mask_ref, wq_ref, wk_ref, wv_ref, wo_ref,
                         w1_ref, b1_ref, w2_ref, b2_ref, o_ref, carry_ref,
                         *, num_heads, d_real):
    """Grid = (batch, layer).  One [S, Dp] slab, all layers carried in VMEM."""
    l = pl.program_id(1)
    n_layers = pl.num_programs(1)

    # Load the layer-0 input into the carry; later layers reuse the carry.
    @pl.when(l == 0)
    def _():
        carry_ref[...] = x_ref[0]

    x = carry_ref[...]                                     # [S, Dp] f32
    S, Dp = x.shape
    H = num_heads
    scale = jnp.float32(1.0 / math.sqrt(d_real // H))

    # Lane mask for the (possibly padded) model dimension.
    lane = jax.lax.broadcasted_iota(jnp.int32, (1, Dp), 1)
    dmask = (lane < d_real).astype(jnp.float32)            # [1, Dp]

    xb = x.astype(jnp.bfloat16)
    xh = jnp.broadcast_to(xb[None, :, :], (H, S, Dp))      # head-batched view

    wq = wq_ref[0]                                         # [H, dk, Dp] bf16
    wk = wk_ref[0]
    wv = wv_ref[0]
    wo = wo_ref[0]

    # ---- MultiheadAttention (q_w / k_w / v_w / fc, no bias) ----
    q = jnp.einsum('hsd,hkd->hsk', xh, wq,
                   preferred_element_type=jnp.float32).astype(jnp.bfloat16)
    k = jnp.einsum('hsd,hkd->hsk', xh, wk,
                   preferred_element_type=jnp.float32).astype(jnp.bfloat16)
    v = jnp.einsum('hsd,hkd->hsk', xh, wv,
                   preferred_element_type=jnp.float32).astype(jnp.bfloat16)

    scores = jnp.einsum('hsk,htk->hst', q, k,
                        preferred_element_type=jnp.float32) * scale  # [H,S,S]
    pad_row = mask_ref[...]                                # [1, 1, S], 1.0 = PAD key
    scores = jnp.where(pad_row > 0.5, jnp.float32(-1e9), scores)

    m = jnp.max(scores, axis=-1, keepdims=True)
    e = jnp.exp(scores - m)
    denom = jnp.sum(e, axis=-1, keepdims=True)
    attn = (e * pl.reciprocal(denom, approx=True)).astype(jnp.bfloat16)

    ctx = jnp.einsum('hst,htk->hsk', attn, v,
                     preferred_element_type=jnp.float32).astype(jnp.bfloat16)
    proj = jnp.einsum('hsk,hkd->hsd', ctx, wo,
                      preferred_element_type=jnp.float32)  # [H, S, Dp]
    attn_out = jnp.sum(proj, axis=0) + x                   # output proj + residual
    attn_out = _layernorm_masked(attn_out, dmask, d_real)

    # ---- FeedForward: Linear -> Dropout(id) -> ReLU -> Linear, +res, LN ----
    h1 = jnp.dot(attn_out.astype(jnp.bfloat16), w1_ref[0],
                 preferred_element_type=jnp.float32) + b1_ref[0]
    h1 = jnp.maximum(h1, 0.0)
    ff = jnp.dot(h1.astype(jnp.bfloat16), w2_ref[0],
                 preferred_element_type=jnp.float32) + b2_ref[0]
    out = _layernorm_masked(ff + attn_out, dmask, d_real)

    carry_ref[...] = out

    @pl.when(l == n_layers - 1)
    def _():
        o_ref[0] = out.astype(o_ref.dtype)


# ----------------------------- plain-JAX glue --------------------------------

def transformer_encoder(token_ids, params, num_heads):
    d_real = params["d_model"]
    emb = params["emb"][token_ids]                        # [B, S, Dp]
    B, S, Dp = emb.shape
    # PositionalEncoding quirk: pe[:batch] broadcast over seq (matches reference)
    x = emb + params["pe"][:B][:, None, :]
    # dropout: identity (eval mode)
    # get_attn_pad_mask: 1.0 where key token id == 0 (PAD); only the row is passed
    pad_row = (token_ids == 0).astype(jnp.float32)[:, None, :]   # [B, 1, S]

    L, H, dk, _ = params["wq"].shape
    Fp = params["w1"].shape[2]

    kernel = partial(fused_encoder_kernel, num_heads=num_heads, d_real=d_real)

    out = pl.pallas_call(
        kernel,
        out_shape=jax.ShapeDtypeStruct((B, S, Dp), jnp.float32),
        grid=(B, L),
        in_specs=[
            pl.BlockSpec((1, S, Dp), lambda b, l: (b, 0, 0)),        # x
            pl.BlockSpec((1, 1, S), lambda b, l: (b, 0, 0)),         # pad row
            pl.BlockSpec((1, H, dk, Dp), lambda b, l: (l, 0, 0, 0)),  # wq
            pl.BlockSpec((1, H, dk, Dp), lambda b, l: (l, 0, 0, 0)),  # wk
            pl.BlockSpec((1, H, dk, Dp), lambda b, l: (l, 0, 0, 0)),  # wv
            pl.BlockSpec((1, H, dk, Dp), lambda b, l: (l, 0, 0, 0)),  # wo
            pl.BlockSpec((1, Dp, Fp), lambda b, l: (l, 0, 0)),        # w1
            pl.BlockSpec((1, 1, Fp), lambda b, l: (l, 0, 0)),         # b1
            pl.BlockSpec((1, Fp, Dp), lambda b, l: (l, 0, 0)),        # w2
            pl.BlockSpec((1, 1, Dp), lambda b, l: (l, 0, 0)),         # b2
        ],
        out_specs=pl.BlockSpec((1, S, Dp), lambda b, l: (b, 0, 0)),
        scratch_shapes=[pltpu.VMEM((S, Dp), jnp.float32)],            # layer carry
        compiler_params=pltpu.CompilerParams(
            dimension_semantics=("parallel", "arbitrary"),
            vmem_limit_bytes=32 * 1024 * 1024),
    )(x, pad_row, params["wq"], params["wk"], params["wv"], params["wo"],
      params["w1"], params["b1"], params["w2"], params["b2"])

    return out[:, :, :d_real]


def make_pe_table(max_len, d_model):
    position = jnp.arange(max_len, dtype=jnp.float32)[:, None]
    div_term = jnp.exp(jnp.arange(0, d_model, 2, dtype=jnp.float32)
                       * (-math.log(10000.0) / d_model))
    pe = jnp.zeros((max_len, d_model), jnp.float32)
    pe = pe.at[:, 0::2].set(jnp.sin(position * div_term))
    pe = pe.at[:, 1::2].set(jnp.cos(position * div_term))
    return pe


def xavier_uniform(key, shape):
    fan_in, fan_out = shape
    a = math.sqrt(6.0 / (fan_in + fan_out))
    return jax.random.uniform(key, shape, jnp.float32, -a, a)


def init_params(key, vocab, d_model, n_layers, num_heads, ff_dim, max_len=128):
    Dp = _round_up(d_model, LANE)
    Fp = _round_up(ff_dim, LANE)
    dk = d_model // num_heads
    keys = jax.random.split(key, 1 + n_layers)

    emb = jax.random.normal(keys[0], (vocab, d_model), jnp.float32) * 0.02
    pe = make_pe_table(max_len, d_model)

    def head_major(w):                         # [in, out] -> [H, dk, Dp] (zero-pad)
        return _pad_to(w.T.reshape(num_heads, dk, d_model), (num_heads, dk, Dp))

    wq_l, wk_l, wv_l, wo_l, w1_l, b1_l, w2_l, b2_l = ([] for _ in range(8))
    for i in range(n_layers):
        lk = jax.random.split(keys[1 + i], 6)
        wq_l.append(head_major(xavier_uniform(lk[0], (d_model, d_model))))
        wk_l.append(head_major(xavier_uniform(lk[1], (d_model, d_model))))
        wv_l.append(head_major(xavier_uniform(lk[2], (d_model, d_model))))
        wo = xavier_uniform(lk[3], (d_model, d_model))     # [in(=H*dk head-major), out]
        wo_l.append(_pad_to(wo.reshape(num_heads, dk, d_model), (num_heads, dk, Dp)))
        w1_l.append(_pad_to(xavier_uniform(lk[4], (d_model, ff_dim)), (Dp, Fp)))
        b1_l.append(_pad_to(jnp.full((1, ff_dim), 0.01, jnp.float32), (1, Fp)))
        w2_l.append(_pad_to(xavier_uniform(lk[5], (ff_dim, d_model)), (Fp, Dp)))
        b2_l.append(_pad_to(jnp.full((1, d_model), 0.01, jnp.float32), (1, Dp)))

    return {
        "d_model": d_model,
        "emb": _pad_to(emb, (vocab, Dp)),
        "pe": _pad_to(pe, (max_len, Dp)),
        "wq": jnp.stack(wq_l).astype(jnp.bfloat16),
        "wk": jnp.stack(wk_l).astype(jnp.bfloat16),
        "wv": jnp.stack(wv_l).astype(jnp.bfloat16),
        "wo": jnp.stack(wo_l).astype(jnp.bfloat16),
        "w1": jnp.stack(w1_l).astype(jnp.bfloat16),
        "b1": jnp.stack(b1_l),                 # f32 (added after f32 accumulation)
        "w2": jnp.stack(w2_l).astype(jnp.bfloat16),
        "b2": jnp.stack(b2_l),                 # f32
    }


if __name__ == "__main__":
    B, S, D, H, FF, L, V = 2, 8, 32, 4, 64, 2, 50
    key = jax.random.PRNGKey(0)
    pkey, tkey = jax.random.split(key)

    params = init_params(pkey, V, D, L, H, FF)
    tokens = jax.random.randint(tkey, (B, S), 1, V)
    tokens = tokens.at[:, -2:].set(0)   # introduce PAD tokens to exercise the mask

    out = transformer_encoder(tokens, params, H)
    jax.block_until_ready(out)
    assert out.shape == (B, S, D) and out.dtype == jnp.float32
    assert bool(jnp.all(jnp.isfinite(out)))
    print("KERNEL_OK")
</pallas_src>

<mosaic_0001>
module attributes {stable_mosaic.version = 11 : i64} {
  func.func @fused_encoder_kernel(%arg0: i32, %arg1: i32, %arg2: memref<1x8x128xf32, #tpu.memory_space<vmem>>, %arg3: memref<1x1x8xf32, #tpu.memory_space<vmem>>, %arg4: memref<1x4x8x128xbf16, #tpu.memory_space<vmem>>, %arg5: memref<1x4x8x128xbf16, #tpu.memory_space<vmem>>, %arg6: memref<1x4x8x128xbf16, #tpu.memory_space<vmem>>, %arg7: memref<1x4x8x128xbf16, #tpu.memory_space<vmem>>, %arg8: memref<1x128x128xbf16, #tpu.memory_space<vmem>>, %arg9: memref<1x1x128xf32, #tpu.memory_space<vmem>>, %arg10: memref<1x128x128xbf16, #tpu.memory_space<vmem>>, %arg11: memref<1x1x128xf32, #tpu.memory_space<vmem>>, %arg12: memref<1x8x128xf32, #tpu.memory_space<vmem>>, %arg13: memref<8x128xf32, #tpu.memory_space<vmem>>) attributes {dimension_semantics = [#tpu.dimension_semantics<parallel>, #tpu.dimension_semantics<arbitrary>], iteration_bounds = array<i64: 2, 2>, scalar_prefetch = 0 : i64, scratch_operands = 1 : i64, tpu.core_type = #tpu.core_type<tc>, window_params = [{transform_indices = @transform_0, window_bounds = array<i64: 1, 8, 128>}, {transform_indices = @transform_1, window_bounds = array<i64: 1, 1, 8>}, {transform_indices = @transform_2, window_bounds = array<i64: 1, 4, 8, 128>}, {transform_indices = @transform_3, window_bounds = array<i64: 1, 4, 8, 128>}, {transform_indices = @transform_4, window_bounds = array<i64: 1, 4, 8, 128>}, {transform_indices = @transform_5, window_bounds = array<i64: 1, 4, 8, 128>}, {transform_indices = @transform_6, window_bounds = array<i64: 1, 128, 128>}, {transform_indices = @transform_7, window_bounds = array<i64: 1, 1, 128>}, {transform_indices = @transform_8, window_bounds = array<i64: 1, 128, 128>}, {transform_indices = @transform_9, window_bounds = array<i64: 1, 1, 128>}, {transform_indices = @transform_10, window_bounds = array<i64: 1, 8, 128>}]} {
    %c0_i32 = arith.constant 0 : i32
    %0 = arith.cmpi eq, %arg1, %c0_i32 : i32
    %1 = arith.extui %0 : i1 to i32
    %c0_i32_0 = arith.constant 0 : i32
    %2 = arith.cmpi ne, %1, %c0_i32_0 : i32
    scf.if %2 {
      %c0_60 = arith.constant 0 : index
      %c0_61 = arith.constant 0 : index
      %c0_62 = arith.constant 0 : index
      %112 = vector.load %arg2[%c0_60, %c0_61, %c0_62] : memref<1x8x128xf32, #tpu.memory_space<vmem>>, vector<1x8x128xf32>
      %113 = vector.shape_cast %112 : vector<1x8x128xf32> to vector<8x128xf32>
      %c0_63 = arith.constant 0 : index
      %c0_64 = arith.constant 0 : index
      %114 = vector.load %arg13[%c0_63, %c0_64] : memref<8x128xf32, #tpu.memory_space<vmem>>, vector<8x128xf32>
      tpu.vector_store %arg13[%c0_63, %c0_64], %113 {strides = array<i32>} : memref<8x128xf32, #tpu.memory_space<vmem>>, vector<8x128xf32>,
    } else {
    }
    %c0 = arith.constant 0 : index
    %c0_1 = arith.constant 0 : index
    %3 = vector.load %arg13[%c0, %c0_1] : memref<8x128xf32, #tpu.memory_space<vmem>>, vector<8x128xf32>
    %4 = tpu.iota {dimensions = array<i32: 1>} : vector<1x128xi32>
    %c32_i32 = arith.constant 32 : i32
    %5 = vector.broadcast %c32_i32 : i32 to vector<1x128xi32>
    %6 = arith.cmpi slt, %4, %5 : vector<1x128xi32>
    %7 = arith.extui %6 : vector<1x128xi1> to vector<1x128xi32>
    %8 = arith.sitofp %7 : vector<1x128xi32> to vector<1x128xf32>
    %9 = arith.truncf %3 : vector<8x128xf32> to vector<8x128xbf16>
    %10 = vector.shape_cast %9 : vector<8x128xbf16> to vector<1x8x128xbf16>
    %11 = vector.shape_cast %10 : vector<1x8x128xbf16> to vector<1x8x128xbf16>
    %12 = vector.broadcast %11 : vector<1x8x128xbf16> to vector<4x8x128xbf16>
    %c0_2 = arith.constant 0 : index
    %c0_3 = arith.constant 0 : index
    %c0_4 = arith.constant 0 : index
    %c0_5 = arith.constant 0 : index
    %13 = vector.load %arg4[%c0_2, %c0_3, %c0_4, %c0_5] : memref<1x4x8x128xbf16, #tpu.memory_space<vmem>>, vector<1x4x8x128xbf16>
    %14 = vector.shape_cast %13 : vector<1x4x8x128xbf16> to vector<4x8x128xbf16>
    %c0_6 = arith.constant 0 : index
    %c0_7 = arith.constant 0 : index
    %c0_8 = arith.constant 0 : index
    %c0_9 = arith.constant 0 : index
    %15 = vector.load %arg5[%c0_6, %c0_7, %c0_8, %c0_9] : memref<1x4x8x128xbf16, #tpu.memory_space<vmem>>, vector<1x4x8x128xbf16>
    %16 = vector.shape_cast %15 : vector<1x4x8x128xbf16> to vector<4x8x128xbf16>
    %c0_10 = arith.constant 0 : index
    %c0_11 = arith.constant 0 : index
    %c0_12 = arith.constant 0 : index
    %c0_13 = arith.constant 0 : index
    %17 = vector.load %arg6[%c0_10, %c0_11, %c0_12, %c0_13] : memref<1x4x8x128xbf16, #tpu.memory_space<vmem>>, vector<1x4x8x128xbf16>
    %18 = vector.shape_cast %17 : vector<1x4x8x128xbf16> to vector<4x8x128xbf16>
    %c0_14 = arith.constant 0 : index
    %c0_15 = arith.constant 0 : index
    %c0_16 = arith.constant 0 : index
    %c0_17 = arith.constant 0 : index
    %19 = vector.load %arg7[%c0_14, %c0_15, %c0_16, %c0_17] : memref<1x4x8x128xbf16, #tpu.memory_space<vmem>>, vector<1x4x8x128xbf16>
    %20 = vector.shape_cast %19 : vector<1x4x8x128xbf16> to vector<4x8x128xbf16>
    "tpu.trace_start"() <{level = 10 : i32, message = "hsd,hkd->hsk"}> : () -> ()
    %cst = arith.constant dense<0.000000e+00> : vector<4x8x8xf32>
    %21 = tpu.matmul %12, %14, %cst {dimension_numbers = #tpu.dot_dimension_numbers<[2], [2], [1], [1], [0, 0, 0, 1, 1, 1], [0], [0]>} : vector<4x8x128xbf16>, vector<4x8x128xbf16>, vector<4x8x8xf32> -> vector<4x8x8xf32>
    "tpu.trace_stop"() : () -> ()
    %22 = arith.truncf %21 : vector<4x8x8xf32> to vector<4x8x8xbf16>
    "tpu.trace_start"() <{level = 10 : i32, message = "hsd,hkd->hsk"}> : () -> ()
    %cst_18 = arith.constant dense<0.000000e+00> : vector<4x8x8xf32>
    %23 = tpu.matmul %12, %16, %cst_18 {dimension_numbers = #tpu.dot_dimension_numbers<[2], [2], [1], [1], [0, 0, 0, 1, 1, 1], [0], [0]>} : vector<4x8x128xbf16>, vector<4x8x128xbf16>, vector<4x8x8xf32> -> vector<4x8x8xf32>
    "tpu.trace_stop"() : () -> ()
    %24 = arith.truncf %23 : vector<4x8x8xf32> to vector<4x8x8xbf16>
    "tpu.trace_start"() <{level = 10 : i32, message = "hsd,hkd->hsk"}> : () -> ()
    %cst_19 = arith.constant dense<0.000000e+00> : vector<4x8x8xf32>
    %25 = tpu.matmul %12, %18, %cst_19 {dimension_numbers = #tpu.dot_dimension_numbers<[2], [2], [1], [1], [0, 0, 0, 1, 1, 1], [0], [0]>} : vector<4x8x128xbf16>, vector<4x8x128xbf16>, vector<4x8x8xf32> -> vector<4x8x8xf32>
    "tpu.trace_stop"() : () -> ()
    %26 = arith.truncf %25 : vector<4x8x8xf32> to vector<4x8x8xbf16>
    "tpu.trace_start"() <{level = 10 : i32, message = "hsk,htk->hst"}> : () -> ()
    %cst_20 = arith.constant dense<0.000000e+00> : vector<4x8x8xf32>
    %27 = tpu.matmul %22, %24, %cst_20 {dimension_numbers = #tpu.dot_dimension_numbers<[2], [2], [1], [1], [0, 0, 0, 1, 1, 1], [0], [0]>} : vector<4x8x8xbf16>, vector<4x8x8xbf16>, vector<4x8x8xf32> -> vector<4x8x8xf32>
    "tpu.trace_stop"() : () -> ()
    %cst_21 = arith.constant 0.353553385 : f32
    %28 = vector.broadcast %cst_21 : f32 to vector<4x8x8xf32>
    %29 = arith.mulf %27, %28 : vector<4x8x8xf32>
    %c0_22 = arith.constant 0 : index
    %c0_23 = arith.constant 0 : index
    %c0_24 = arith.constant 0 : index
    %30 = vector.load %arg3[%c0_22, %c0_23, %c0_24] : memref<1x1x8xf32, #tpu.memory_space<vmem>>, vector<1x1x8xf32>
    %cst_25 = arith.constant 5.000000e-01 : f32
    %31 = vector.broadcast %cst_25 : f32 to vector<1x1x8xf32>
    %32 = arith.cmpf ogt, %30, %31 : vector<1x1x8xf32>
    %cst_26 = arith.constant -1.000000e+09 : f32
    %33 = vector.shape_cast %32 : vector<1x1x8xi1> to vector<1x1x8xi1>
    %34 = vector.broadcast %33 : vector<1x1x8xi1> to vector<4x8x8xi1>
    %35 = vector.broadcast %cst_26 : f32 to vector<4x8x8xf32>
    %36 = arith.select %34, %35, %29 : vector<4x8x8xi1>, vector<4x8x8xf32>
    %cst_27 = arith.constant dense<0xFF800000> : vector<4x8xf32>
    %37 = vector.multi_reduction <maximumf>, %36, %cst_27 [2] : vector<4x8x8xf32> to vector<4x8xf32>
    %38 = vector.shape_cast %37 : vector<4x8xf32> to vector<4x8x1xf32>
    %39 = vector.broadcast %38 : vector<4x8x1xf32> to vector<4x8x8xf32>
    %40 = arith.subf %36, %39 : vector<4x8x8xf32>
    %41 = math.exp %40 : vector<4x8x8xf32>
    %cst_28 = arith.constant dense<0.000000e+00> : vector<4x8xf32>
    %42 = vector.multi_reduction <add>, %41, %cst_28 [2] : vector<4x8x8xf32> to vector<4x8xf32>
    %43 = vector.shape_cast %42 : vector<4x8xf32> to vector<4x8x1xf32>
    %44 = tpu.reciprocal %43 {approx = true} : vector<4x8x1xf32> -> vector<4x8x1xf32>
    %45 = vector.broadcast %44 : vector<4x8x1xf32> to vector<4x8x8xf32>
    %46 = arith.mulf %41, %45 : vector<4x8x8xf32>
    %47 = arith.truncf %46 : vector<4x8x8xf32> to vector<4x8x8xbf16>
    "tpu.trace_start"() <{level = 10 : i32, message = "hst,htk->hsk"}> : () -> ()
    %cst_29 = arith.constant dense<0.000000e+00> : vector<4x8x8xf32>
    %48 = tpu.matmul %47, %26, %cst_29 {dimension_numbers = #tpu.dot_dimension_numbers<[2], [1], [1], [2], [0, 0, 0, 1, 1, 2], [0], [0]>} : vector<4x8x8xbf16>, vector<4x8x8xbf16>, vector<4x8x8xf32> -> vector<4x8x8xf32>
    "tpu.trace_stop"() : () -> ()
    %49 = arith.truncf %48 : vector<4x8x8xf32> to vector<4x8x8xbf16>
    "tpu.trace_start"() <{level = 10 : i32, message = "hsk,hkd->hsd"}> : () -> ()
    %cst_30 = arith.constant dense<0.000000e+00> : vector<4x8x128xf32>
    %50 = tpu.matmul %49, %20, %cst_30 {dimension_numbers = #tpu.dot_dimension_numbers<[2], [1], [1], [2], [0, 0, 0, 1, 1, 2], [0], [0]>} : vector<4x8x8xbf16>, vector<4x8x128xbf16>, vector<4x8x128xf32> -> vector<4x8x128xf32>
    "tpu.trace_stop"() : () -> ()
    %cst_31 = arith.constant dense<0.000000e+00> : vector<8x128xf32>
    %51 = vector.multi_reduction <add>, %50, %cst_31 [0] : vector<4x8x128xf32> to vector<8x128xf32>
    %52 = arith.addf %51, %3 : vector<8x128xf32>
    %cst_32 = arith.constant dense<0.000000e+00> : vector<8xf32>
    %53 = vector.multi_reduction <add>, %52, %cst_32 [1] : vector<8x128xf32> to vector<8xf32>
    %54 = vector.shape_cast %53 : vector<8xf32> to vector<8x1xf32>
    %cst_33 = arith.constant 3.125000e-02 : f32
    %55 = vector.broadcast %cst_33 : f32 to vector<8x1xf32>
    %56 = arith.mulf %54, %55 : vector<8x1xf32>
    %57 = vector.broadcast %56 : vector<8x1xf32> to vector<8x128xf32>
    %58 = arith.subf %52, %57 : vector<8x128xf32>
    %59 = vector.broadcast %8 : vector<1x128xf32> to vector<8x128xf32>
    %60 = arith.mulf %58, %59 : vector<8x128xf32>
    %61 = arith.mulf %60, %60 : vector<8x128xf32>
    %cst_34 = arith.constant dense<0.000000e+00> : vector<8xf32>
    %62 = vector.multi_reduction <add>, %61, %cst_34 [1] : vector<8x128xf32> to vector<8xf32>
    %63 = vector.shape_cast %62 : vector<8xf32> to vector<8x1xf32>
    %cst_35 = arith.constant 3.125000e-02 : f32
    %64 = vector.broadcast %cst_35 : f32 to vector<8x1xf32>
    %65 = arith.mulf %63, %64 : vector<8x1xf32>
    %cst_36 = arith.constant 9.99999974E-6 : f32
    %66 = vector.broadcast %cst_36 : f32 to vector<8x1xf32>
    %67 = arith.addf %65, %66 : vector<8x1xf32>
    %68 = math.rsqrt %67 : vector<8x1xf32>
    %69 = vector.broadcast %68 : vector<8x1xf32> to vector<8x128xf32>
    %70 = arith.mulf %60, %69 : vector<8x128xf32>
    %71 = arith.truncf %70 : vector<8x128xf32> to vector<8x128xbf16>
    %c0_37 = arith.constant 0 : index
    %c0_38 = arith.constant 0 : index
    %c0_39 = arith.constant 0 : index
    %72 = vector.load %arg8[%c0_37, %c0_38, %c0_39] : memref<1x128x128xbf16, #tpu.memory_space<vmem>>, vector<1x128x128xbf16>
    %73 = vector.shape_cast %72 : vector<1x128x128xbf16> to vector<128x128xbf16>
    %cst_40 = arith.constant dense<0.000000e+00> : vector<8x128xf32>
    %74 = tpu.matmul %71, %73, %cst_40 {dimension_numbers = #tpu.dot_dimension_numbers<[1], [0], [0], [1], [0, 0, 1, 1], [], []>} : vector<8x128xbf16>, vector<128x128xbf16>, vector<8x128xf32> -> vector<8x128xf32>
    %c0_41 = arith.constant 0 : index
    %c0_42 = arith.constant 0 : index
    %c0_43 = arith.constant 0 : index
    %75 = vector.load %arg9[%c0_41, %c0_42, %c0_43] : memref<1x1x128xf32, #tpu.memory_space<vmem>>, vector<1x1x128xf32>
    %76 = vector.shape_cast %75 : vector<1x1x128xf32> to vector<1x128xf32>
    %77 = vector.broadcast %76 : vector<1x128xf32> to vector<8x128xf32>
    %78 = arith.addf %74, %77 : vector<8x128xf32>
    %cst_44 = arith.constant 0.000000e+00 : f32
    %79 = vector.broadcast %cst_44 : f32 to vector<8x128xf32>
    %80 = arith.maximumf %78, %79 : vector<8x128xf32>
    %81 = arith.truncf %80 : vector<8x128xf32> to vector<8x128xbf16>
    %c0_45 = arith.constant 0 : index
    %c0_46 = arith.constant 0 : index
    %c0_47 = arith.constant 0 : index
    %82 = vector.load %arg10[%c0_45, %c0_46, %c0_47] : memref<1x128x128xbf16, #tpu.memory_space<vmem>>, vector<1x128x128xbf16>
    %83 = vector.shape_cast %82 : vector<1x128x128xbf16> to vector<128x128xbf16>
    %cst_48 = arith.constant dense<0.000000e+00> : vector<8x128xf32>
    %84 = tpu.matmul %81, %83, %cst_48 {dimension_numbers = #tpu.dot_dimension_numbers<[1], [0], [0], [1], [0, 0, 1, 1], [], []>} : vector<8x128xbf16>, vector<128x128xbf16>, vector<8x128xf32> -> vector<8x128xf32>
    %c0_49 = arith.constant 0 : index
    %c0_50 = arith.constant 0 : index
    %c0_51 = arith.constant 0 : index
    %85 = vector.load %arg11[%c0_49, %c0_50, %c0_51] : memref<1x1x128xf32, #tpu.memory_space<vmem>>, vector<1x1x128xf32>
    %86 = vector.shape_cast %85 : vector<1x1x128xf32> to vector<1x128xf32>
    %87 = vector.broadcast %86 : vector<1x128xf32> to vector<8x128xf32>
    %88 = arith.addf %84, %87 : vector<8x128xf32>
    %89 = arith.addf %88, %70 : vector<8x128xf32>
    %cst_52 = arith.constant dense<0.000000e+00> : vector<8xf32>
    %90 = vector.multi_reduction <add>, %89, %cst_52 [1] : vector<8x128xf32> to vector<8xf32>
    %91 = vector.shape_cast %90 : vector<8xf32> to vector<8x1xf32>
    %cst_53 = arith.constant 3.125000e-02 : f32
    %92 = vector.broadcast %cst_53 : f32 to vector<8x1xf32>
    %93 = arith.mulf %91, %92 : vector<8x1xf32>
    %94 = vector.broadcast %93 : vector<8x1xf32> to vector<8x128xf32>
    %95 = arith.subf %89, %94 : vector<8x128xf32>
    %96 = vector.broadcast %8 : vector<1x128xf32> to vector<8x128xf32>
    %97 = arith.mulf %95, %96 : vector<8x128xf32>
    %98 = arith.mulf %97, %97 : vector<8x128xf32>
    %cst_54 = arith.constant dense<0.000000e+00> : vector<8xf32>
    %99 = vector.multi_reduction <add>, %98, %cst_54 [1] : vector<8x128xf32> to vector<8xf32>
    %100 = vector.shape_cast %99 : vector<8xf32> to vector<8x1xf32>
    %cst_55 = arith.constant 3.125000e-02 : f32
    %101 = vector.broadcast %cst_55 : f32 to vector<8x1xf32>
    %102 = arith.mulf %100, %101 : vector<8x1xf32>
    %cst_56 = arith.constant 9.99999974E-6 : f32
    %103 = vector.broadcast %cst_56 : f32 to vector<8x1xf32>
    %104 = arith.addf %102, %103 : vector<8x1xf32>
    %105 = math.rsqrt %104 : vector<8x1xf32>
    %106 = vector.broadcast %105 : vector<8x1xf32> to vector<8x128xf32>
    %107 = arith.mulf %97, %106 : vector<8x128xf32>
    %c0_57 = arith.constant 0 : index
    %c0_58 = arith.constant 0 : index
    %108 = vector.load %arg13[%c0_57, %c0_58] : memref<8x128xf32, #tpu.memory_space<vmem>>, vector<8x128xf32>
    tpu.vector_store %arg13[%c0_57, %c0_58], %107 {strides = array<i32>} : memref<8x128xf32, #tpu.memory_space<vmem>>, vector<8x128xf32>,
    %c1_i32 = arith.constant 1 : i32
    %109 = arith.cmpi eq, %arg1, %c1_i32 : i32
    %110 = arith.extui %109 : i1 to i32
    %c0_i32_59 = arith.constant 0 : i32
    %111 = arith.cmpi ne, %110, %c0_i32_59 : i32
    scf.if %111 {
      %c0_60 = arith.constant 0 : index
      %c0_61 = arith.constant 0 : index
      %c0_62 = arith.constant 0 : index
      %112 = vector.load %arg12[%c0_60, %c0_61, %c0_62] : memref<1x8x128xf32, #tpu.memory_space<vmem>>, vector<1x8x128xf32>
      %113 = vector.shape_cast %112 : vector<1x8x128xf32> to vector<8x128xf32>
      %114 = vector.shape_cast %107 : vector<8x128xf32> to vector<1x8x128xf32>
      tpu.vector_store %arg12[%c0_60, %c0_61, %c0_62], %114 {strides = array<i32>} : memref<1x8x128xf32, #tpu.memory_space<vmem>>, vector<1x8x128xf32>,
    } else {
    }
    return
  }
  func.func @transform_0(%arg0: i32, %arg1: i32) -> (i32, i32, i32) {
    %c0_i32 = arith.constant 0 : i32
    %c0_i32_0 = arith.constant 0 : i32
    %c0_i32_1 = arith.constant 0 : i32
    return %arg0, %c0_i32, %c0_i32_0 : i32, i32, i32
  }
  func.func @transform_1(%arg0: i32, %arg1: i32) -> (i32, i32, i32) {
    %c0_i32 = arith.constant 0 : i32
    %c0_i32_0 = arith.constant 0 : i32
    %c0_i32_1 = arith.constant 0 : i32
    return %arg0, %c0_i32, %c0_i32_0 : i32, i32, i32
  }
  func.func @transform_2(%arg0: i32, %arg1: i32) -> (i32, i32, i32, i32) {
    %c0_i32 = arith.constant 0 : i32
    %c0_i32_0 = arith.constant 0 : i32
    %c0_i32_1 = arith.constant 0 : i32
    %c0_i32_2 = arith.constant 0 : i32
    return %arg1, %c0_i32, %c0_i32_0, %c0_i32_1 : i32, i32, i32, i32
  }
  func.func @transform_3(%arg0: i32, %arg1: i32) -> (i32, i32, i32, i32) {
    %c0_i32 = arith.constant 0 : i32
    %c0_i32_0 = arith.constant 0 : i32
    %c0_i32_1 = arith.constant 0 : i32
    %c0_i32_2 = arith.constant 0 : i32
    return %arg1, %c0_i32, %c0_i32_0, %c0_i32_1 : i32, i32, i32, i32
  }
  func.func @transform_4(%arg0: i32, %arg1: i32) -> (i32, i32, i32, i32) {
    %c0_i32 = arith.constant 0 : i32
    %c0_i32_0 = arith.constant 0 : i32
    %c0_i32_1 = arith.constant 0 : i32
    %c0_i32_2 = arith.constant 0 : i32
    return %arg1, %c0_i32, %c0_i32_0, %c0_i32_1 : i32, i32, i32, i32
  }
  func.func @transform_5(%arg0: i32, %arg1: i32) -> (i32, i32, i32, i32) {
    %c0_i32 = arith.constant 0 : i32
    %c0_i32_0 = arith.constant 0 : i32
    %c0_i32_1 = arith.constant 0 : i32
    %c0_i32_2 = arith.constant 0 : i32
    return %arg1, %c0_i32, %c0_i32_0, %c0_i32_1 : i32, i32, i32, i32
  }
  func.func @transform_6(%arg0: i32, %arg1: i32) -> (i32, i32, i32) {
    %c0_i32 = arith.constant 0 : i32
    %c0_i32_0 = arith.constant 0 : i32
    %c0_i32_1 = arith.constant 0 : i32
    return %arg1, %c0_i32, %c0_i32_0 : i32, i32, i32
  }
  func.func @transform_7(%arg0: i32, %arg1: i32) -> (i32, i32, i32) {
    %c0_i32 = arith.constant 0 : i32
    %c0_i32_0 = arith.constant 0 : i32
    %c0_i32_1 = arith.constant 0 : i32
    return %arg1, %c0_i32, %c0_i32_0 : i32, i32, i32
  }
  func.func @transform_8(%arg0: i32, %arg1: i32) -> (i32, i32, i32) {
    %c0_i32 = arith.constant 0 : i32
    %c0_i32_0 = arith.constant 0 : i32
    %c0_i32_1 = arith.constant 0 : i32
    return %arg1, %c0_i32, %c0_i32_0 : i32, i32, i32
  }
  func.func @transform_9(%arg0: i32, %arg1: i32) -> (i32, i32, i32) {
    %c0_i32 = arith.constant 0 : i32
    %c0_i32_0 = arith.constant 0 : i32
    %c0_i32_1 = arith.constant 0 : i32
    return %arg1, %c0_i32, %c0_i32_0 : i32, i32, i32
  }
  func.func @transform_10(%arg0: i32, %arg1: i32) -> (i32, i32, i32) {
    %c0_i32 = arith.constant 0 : i32
    %c0_i32_0 = arith.constant 0 : i32
    %c0_i32_1 = arith.constant 0 : i32
    return %arg0, %c0_i32, %c0_i32_0 : i32, i32, i32
  }
}

</mosaic_0001>

<bundles_post_ra>
// kernel: tpu_custom_call.1
= control target key start
LH: loop header
LB: loop body
LE: loop exit
PB: predicated region body
PF: predicated region fallthrough
CT: control target
= control target key end

     0   :  { %s2889_s0 = inlined_call_operand.hbm [shape: f32[2,8,128], index: 0, kind: input, shape index: {}]   ;;  %s2890_s1 = inlined_call_operand.hbm [shape: f32[2,1,8], index: 1, kind: input, shape index: {}]   ;;  %s2891_s2 = inlined_call_operand.hbm [shape: bf16[2,4,8,128], index: 2, kind: input, shape index: {}]   ;;  %s2892_s3 = inlined_call_operand.hbm [shape: bf16[2,4,8,128], index: 3, kind: input, shape index: {}]   ;;  %s2893_s4 = inlined_call_operand.hbm [shape: bf16[2,4,8,128], index: 4, kind: input, shape index: {}]   ;;  %s2894_s5 = inlined_call_operand.hbm [shape: bf16[2,4,8,128], index: 5, kind: input, shape index: {}]   ;;  %s2895_s6 = inlined_call_operand.hbm [shape: bf16[2,128,128], index: 6, kind: input, shape index: {}]   ;;  %s2896_s7 = inlined_call_operand.vmem [shape: f32[2,1,128], index: 7, kind: input, shape index: {}]   ;;  %s2897_s8 = inlined_call_operand.hbm [shape: bf16[2,128,128], index: 8, kind: input, shape index: {}]   ;;  %s2898_s9 = inlined_call_operand.vmem [shape: f32[2,1,128], index: 9, kind: input, shape index: {}]   ;;  %s2899_s10 = inlined_call_operand.hbm [shape: f32[2,8,128], index: 10, kind: output, shape index: {}]  }
   0x1   :  { %2920 = sst [smem:[#allocation40_spill]] %s2890_s1 }
   0x2   :  { %2921 = sst [smem:[#allocation41_spill]] %s2892_s3 }
   0x3   :  { %2922 = sst [smem:[#allocation42_spill]] %s2894_s5 }
   0x4   :  { %2923 = sst [smem:[#allocation43_spill]] %s2896_s7 }
   0x5   :  { %2924 = sst [smem:[#allocation44_spill]] %s2898_s9 }
   0x6   :  { %2925 = sst [smem:[#allocation45_spill]] %s2899_s10 }
   0x7   :  { %15 = vsyncpa [#allocation4], 0 }
   0x8   :  { %17 = vsyncpa [#allocation4 + $0x1], 0 }
   0x9   :  { %18 = vsyncpa [#allocation7], 0 }
   0xa   :  { %20 = vsyncpa [#allocation7 + $0x1], 0 }
   0xb   :  { %21 = vsyncpa [#allocation10], 0 }
   0xc   :  { %23 = vsyncpa [#allocation10 + $0x1], 0 }
   0xd   :  { %24 = vsyncpa [#allocation13], 0 }
   0xe   :  { %26 = vsyncpa [#allocation13 + $0x1], 0 }
   0xf   :  { %27 = vsyncpa [#allocation16], 0 }
  0x10   :  { %29 = vsyncpa [#allocation16 + $0x1], 0 }
  0x11   :  { %30 = vsyncpa [#allocation5], 0 }
  0x12   :  { %32 = vsyncpa [#allocation5 + $0x1], 0  ;;  %s2413_s13 = smov 0   ;;  %s2415_s14 = smov 0  }
  0x13   :  { %s2417_s15 = smov 0   ;;  %s2419_s16 = smov 0  }
  0x14   :  { %s2421_s17 = smov 0   ;;  %s2423_s18 = smov 0  }
  0x15   :  { %s2425_s19 = smov 0   ;;  %s2427_s20 = smov 0  }
  0x16   :  { %s2429_s21 = smov 0   ;;  %s2431_s22 = smov 0  }
  0x17   :  { %s2433_s23 = smov 0  }
  0x18 LB: > { %2926 = sst [smem:[#allocation25_spill]] %s2316_s14  ;;  %s2469_s24 = sadd.s32 4294967295, %s2352_s23   ;;  %s2352_s23 = sphi %s2433_s23, %s38_s23   ;;  %s2348_s22 = sphi %s2431_s22, %s2986_s22   ;;  %s2344_s21 = sphi %s2429_s21, %s2985_s21   ;;  %s2340_s20 = sphi %s2427_s20, %s2984_s20   ;;  %s2336_s19 = sphi %s2425_s19, %s2983_s19   ;;  %s2332_s18 = sphi %s2423_s18, %s2978_s18   ;;  %s2328_s17 = sphi %s2421_s17, %s2982_s17   ;;  %s2324_s16 = sphi %s2419_s16, %s2981_s16   ;;  %s2320_s15 = sphi %s2417_s15, %s2976_s15   ;;  %s2316_s14 = sphi %s2415_s14, %s2975_s14   ;;  %s2312_s13 = sphi %s2413_s13, %s2974_s13  }
  0x19   : > { %2927 = sst [smem:[#allocation26_spill]] %s2320_s15  ;;  %s1670_s25 = sadd.s32 4294967294, %s2352_s23  }
  0x1a   : > { %2928 = sst [smem:[#allocation27_spill]] %s2324_s16  ;;  %s47_s26 = sadd.s32 1, %s2344_s21 }
  0x1b   : > { %2929 = sst [smem:[#allocation28_spill]] %s2332_s18  ;;  %s50_s27 = sadd.s32 1, %s2348_s22 }
  0x1c   : > { %2930 = sst [smem:[#allocation29_spill]] %s2336_s19  ;;  %p48_p0 = scmp.ge.s32.totalorder %s47_s26, 2 }
  0x1d   : > { %2931 = sst [smem:[#allocation30_spill]] %s2340_s20  ;;  %s57_s28 = sadd.s32 1, %s2332_s18 }
  0x1e   : > { %2932 = sst [smem:[#allocation31_spill]] %s2352_s23  ;;  %p64_p1 = scmp.ne.s32.totalorder %s2332_s18, %s2328_s17 }
  0x1f   : > { %2933 = sst [smem:[#allocation32_spill]] %s2469_s24  ;;  %p65_p2 = scmp.eq.s32.totalorder %s2352_s23, 0 }
  0x20   : > { %s2988_s26 = smov (%p48_p0, %s47_s26), 0  ;;  %s2990_s27 = smov (!%p48_p0, %s50_s27), %s2348_s22 }
  0x21   : > { %2934 = sst [smem:[#allocation33_spill]] %s2988_s26  ;;  %p2486_p3 = por %p65_p2, %p64_p1 }
  0x22   : > { %p2902_p4 = scmp.ne.s32.totalorder %s2328_s17, %s2324_s16  ;;  %p52_p5 = scmp.ge.s32.totalorder %s2990_s27, 2 }
  0x23   : > { %p71_p6 = scmp.eq.s32.totalorder %s2469_s24, 0  ;;  %s106_s30 = ssub.s32 %s2344_s21, %s2988_s26 }
  0x24   : > { %s109_s11 = sadd.s32 1, %s2320_s15  ;;  %s2992_s27 = smov (%p52_p5, %s2990_s27), 0 }
  0x25   : > { %2936 = sst [smem:[#allocation34_spill]] %s2992_s27  ;;  %p2503_p7 = por %p71_p6, %p2902_p4 }
  0x26   : > { %p107_p8 = scmp.eq.s32.totalorder %s106_s30, 0  ;;  %s54_s10 = ssub.s32 %s2348_s22, %s2992_s27 }
  0x27   : > { %p116_p9 = scmp.ne.s32.totalorder %s2320_s15, %s2316_s14  ;;  %p55_p10 = scmp.eq.s32.totalorder %s54_s10, 0 }
  0x28   : > { %p122_p11 = scmp.ne.s32.totalorder %s2316_s14, %s2312_s13  ;;  %p328_p0 = scmp.eq.s32.totalorder %s2469_s24, 3 }
  0x29   : > { %s2514_s26 = scalar_select %p107_p8, %s2320_s15, %s109_s11  }
  0x2a   : > { %s2517_s20 = scalar_select %p55_p10, %s2332_s18, %s57_s28  }
  0x2b   : > { %2938 = sst [smem:[#allocation35_spill]] %s2514_s26  ;;  %p2521_p12 = por %p116_p9, %p65_p2 }
  0x2c   : > { %2939 = sst [smem:[#allocation36_spill]] %s2517_s20  ;;  %p2527_p13 = por %p122_p11, %p71_p6 }
  0x2d   : > { %p334_p5 = scmp.eq.s32.totalorder %s1670_s25, 3  ;;  %p1854_p4 = scmp.lt.s32.totalorder %s2352_s23, 4 }
  0x2e   : > { %s2941_s7 = scalar_select %p2527_p13, 1, 0 }
  0x2f   : > { %p2536_p8 = por %p328_p0, %p64_p1  ;;  %p2945_p2 = scmp.ne.s32.totalorder %s2328_s17, %s2324_s16 }
  0x30   : > { %2942 = sst [smem:[#allocation37_spill]] %s2941_s7  ;;  %s2548_s28 = sand.u32 1, %s2332_s18  }
  0x31   : > { %s2943_s10 = scalar_select %p2536_p8, 1, 0 }
  0x32   : > { %p2543_p9 = por %p334_p5, %p2945_p2  ;;  %p2552_p6 = pnand %p1854_p4, %p2486_p3 }
  0x33   : > { %2944 = sst [smem:[#allocation38_spill]] %s2943_s10  ;;  %s2557_s30 = sand.u32 1, %s2352_s23  }
  0x34   : > { %s2946_s13 = scalar_select %p2543_p9, 1, 0 }
  0x35   : > { %s2949_s1 = sld [smem:[#allocation40_spill]]  ;;  %s376_s26 = scalar_lea.vmem [#allocation6], %s2548_s28 }
  0x36   : > { %2947 = sst [smem:[#allocation39_spill]] %s2946_s13  ;;  %s383_s13 = sshll.u32 %s376_s26, 4  ;;  %s384_s13 = int_to_ptr.vmem [resolvable:$true] %s383_s13 }
  0x37   : > { %p2566_p1 = pnand %p1854_p4, %p2521_p12  ;;  %s2907_s16 = scalar_lea.sflag [#allocation7], %s2557_s30 }
  0x38   : > { %p1693_p3 = scmp.ge.s32.totalorder %s2352_s23, 1  ;;  %p532_p10 = scmp.lt.s32.totalorder %s2352_s23, 5 }
  0x39   : > { %s2578_s27 = sand.u32 1, %s2320_s15   ;;  %s2584_s9 = sshll.u32 %s2344_s21, 4 }
  0x3a   : > { %p2586_p4 = pnand %p1693_p3, %p532_p10  ;;  %s2952_s3 = sld [smem:[#allocation41_spill]] }
  0x3b   : > { %s379_s20 = scalar_lea.hbm %s2949_s1, %s2348_s22  ;;  %s2917_s23 = scalar_lea.sflag [#allocation10], %s2557_s30 }
  0x3c   : > { %s381_s18 = sshll.u32 %s379_s20, 4  ;;  %s2581_s20 = sshll.u32 %s2578_s27, 4  ;;  %s382_s18 = int_to_ptr.hbm [resolvable:$true] %s381_s18 }
  0x3d   : > { %1831 = dma.hbm_to_vmem [thread:$0]  (!%p2552_p6), %s382_s18, 16, %s384_s13, %s2907_s16  }
  0x3e   : > { %s416_s16 = scalar_lea.vmem [#allocation9], %s2581_s20  ;;  %s2354_s10 = smov 64  }
  0x3f   : > { %s424_s1 = sshll.u32 %s416_s16, 4  ;;  %s2355_s19 = smov 4   ;;  %s425_s1 = int_to_ptr.vmem [resolvable:$true] %s424_s1 }
  0x40   : > { %s421_s11 = scalar_lea.hbm %s2952_s3, %s2584_s9  ;;  %s2953_s5 = sld [smem:[#allocation42_spill]] }
  0x41   : > { %s422_s15 = sshll.u32 %s421_s11, 4  ;;  %s460_s16 = scalar_lea.vmem [#allocation12], %s2581_s20  ;;  %s423_s15 = int_to_ptr.hbm [resolvable:$true] %s422_s15 }
  0x42   : > { %1837 = dma.hbm_to_vmem [thread:$0]  (!%p2566_p1), %s423_s15, 256, %s425_s1, %s2917_s23, %s2354_s10, %s2354_s10, %s2355_s19  }
  0x43   : > { %s468_s11 = sshll.u32 %s460_s16, 4  ;;  %s2919_s14 = scalar_lea.sflag [#allocation13], %s2557_s30  ;;  %s469_s11 = int_to_ptr.vmem [resolvable:$true] %s468_s11 }
  0x44   : > { %s1673_s1 = sshll.u32 %s2548_s28, 3  ;;  %s1674_s15 = sshll.u32 %s2348_s22, 3 }
  0x45   : > { %s362_s16 = scalar_lea.hbm %s2889_s0, %s1674_s15  ;;  %s358_s23 = scalar_lea.vmem [#allocation3], %s1673_s1 }
  0x46   : > { %s465_s3 = scalar_lea.hbm %s2953_s5, %s2584_s9  ;;  %s366_s5 = sshll.u32 %s358_s23, 4  ;;  %s367_s5 = int_to_ptr.vmem [resolvable:$true] %s366_s5 }
  0x47   : > { %s466_s7 = sshll.u32 %s465_s3, 4  ;;  %s364_s3 = sshll.u32 %s362_s16, 4  ;;  %s467_s7 = int_to_ptr.hbm [resolvable:$true] %s466_s7  ;;  %s365_s3 = int_to_ptr.hbm [resolvable:$true] %s364_s3 }
  0x48   : > { %1843 = dma.hbm_to_vmem [thread:$0]  (!%p2566_p1), %s467_s7, 256, %s469_s11, %s2919_s14, %s2354_s10, %s2354_s10, %s2355_s19  }
  0x49   : > { %s355_s24 = scalar_lea.sflag [#allocation4], %s2548_s28  ;;  %s399_s14 = scalar_lea.hbm %s2891_s2, %s2584_s9 }
  0x4a   : > { %1828 = dma.hbm_to_vmem [thread:$0]  (!%p2552_p6), %s365_s3, 128, %s367_s5, %s355_s24  }
  0x4b   : > { %s400_s18 = sshll.u32 %s399_s14, 4  ;;  %s394_s13 = scalar_lea.vmem [#allocation8], %s2581_s20  ;;  %s401_s18 = int_to_ptr.hbm [resolvable:$true] %s400_s18 }
  0x4c   : > { %s402_s15 = sshll.u32 %s394_s13, 4  ;;  %s2954_s23 = scalar_lea.sflag [#allocation7], %s2557_s30  ;;  %s403_s15 = int_to_ptr.vmem [resolvable:$true] %s402_s15 }
  0x4d   : > { %1834 = dma.hbm_to_vmem [thread:$0]  (!%p2566_p1), %s401_s18, 256, %s403_s15, %s2954_s23, %s2354_s10, %s2354_s10, %s2355_s19  }
  0x4e   : > { %s443_s5 = scalar_lea.hbm %s2893_s4, %s2584_s9  ;;  %s438_s1 = scalar_lea.vmem [#allocation11], %s2581_s20 }
  0x4f   : > { %s444_s24 = sshll.u32 %s443_s5, 4  ;;  %s446_s16 = sshll.u32 %s438_s1, 4  ;;  %s445_s24 = int_to_ptr.hbm [resolvable:$true] %s444_s24  ;;  %s447_s16 = int_to_ptr.vmem [resolvable:$true] %s446_s16 }
  0x50   : > { %s2955_s14 = scalar_lea.sflag [#allocation10], %s2557_s30  ;;  %s1687_s3 = sshll.u32 %s2578_s27, 6 }
  0x51   : > { %1840 = dma.hbm_to_vmem [thread:$0]  (!%p2566_p1), %s445_s24, 256, %s447_s16, %s2955_s14, %s2354_s10, %s2354_s10, %s2355_s19  }
  0x52   : > { %s1789_s7 = sshll.u32 %s2344_s21, 6  ;;  %s482_s15 = scalar_lea.vmem [#allocation14], %s1687_s3 }
  0x53   : > { %s487_s13 = scalar_lea.hbm %s2895_s6, %s1789_s7  ;;  %s490_s20 = sshll.u32 %s482_s15, 4  ;;  %s491_s20 = int_to_ptr.vmem [resolvable:$true] %s490_s20 }
  0x54   : > { %s488_s9 = sshll.u32 %s487_s13, 4  ;;  %s2956_s23 = scalar_lea.sflag [#allocation13], %s2557_s30  ;;  %s489_s9 = int_to_ptr.hbm [resolvable:$true] %s488_s9 }
  0x55   : > { %1846 = dma.hbm_to_vmem [thread:$0]  (!%p2566_p1), %s489_s9, 1024, %s491_s20, %s2956_s23, %s2354_s10, %s2354_s10, %s2355_s19  }
  0x56   : > { %s515_s5 = scalar_lea.hbm %s2897_s8, %s1789_s7  ;;  %s510_s24 = scalar_lea.vmem [#allocation15], %s1687_s3 }
  0x57   : > { %s518_s1 = sshll.u32 %s510_s24, 4  ;;  %s516_s16 = sshll.u32 %s515_s5, 4  ;;  %s519_s1 = int_to_ptr.vmem [resolvable:$true] %s518_s1  ;;  %s517_s16 = int_to_ptr.hbm [resolvable:$true] %s516_s16 }
  0x58   : > { %s507_s14 = scalar_lea.sflag [#allocation16], %s2578_s27  ;;  %536 = sbr.rel (%p2586_p4) target bundleno = 1805 (0x70d), region = 60 }
  0x59   : > { %1849 = dma.hbm_to_vmem [thread:$0]  (!%p2566_p1), %s517_s16, 1024, %s519_s1, %s507_s14, %s2354_s10, %s2354_s10, %s2355_s19  }
  0x5a   : > { %s2672_s30 = sand.u32 (!%p2586_p4), 1, %s2328_s17  }
  0x5b   : > { %s1694_s3 = sshll.u32 (!%p2586_p4), %s2672_s30, 3  ;;  %s539_s7 = scalar_lea.sflag (!%p2586_p4), [#allocation4], %s2672_s30 }
  0x5c   : > { %s2678_s11 = scalar_lea.vmem (!%p2586_p4), [#allocation3], %s1694_s3 }
  0x5d   : > { %2283 = dma.done.wait (%p2503_p7), %s539_s7, 128  }
  0x5e   : > { %2285 = vsyncadd (%p2503_p7), %s539_s7, 4294967168  ;;  %s2957_s19 = sld [smem:[#allocation32_spill]]  ;;  %s551_s27 = scalar_lea.vmem [#allocation6], %s2672_s30 }
  0x64   : > { %s548_s10 = sand.u32 1, %s2957_s19  }
  0x65   : > { %s549_s29 = scalar_lea.sflag [#allocation7], %s548_s10 }
  0x66   : > { %2287 = dma.done.wait (%p2503_p7), %s549_s29, 16  }
  0x67   : > { %2289 = vsyncadd (%p2503_p7), %s549_s29, 4294967280  ;;  %s2958_s26 = sld [smem:[#allocation25_spill]] }
  0x6d   : > { %s559_s13 = sand.u32 1, %s2958_s26  }
  0x6e   : > { %s1695_s9 = sshll.u32 %s559_s13, 4 }
  0x6f   : > { %s2691_s15 = scalar_lea.vmem [#allocation8], %s1695_s9 }
  0x70   : > { %2291 = dma.done.wait (%p2527_p13), %s549_s29, 256  }
  0x71   : > { %2293 = vsyncadd (%p2527_p13), %s549_s29, 4294967040  ;;  %s568_s20 = scalar_lea.sflag [#allocation10], %s548_s10  ;;  %s2697_s23 = scalar_lea.vmem [#allocation9], %s1695_s9 }
  0x72   : > { %2295 = dma.done.wait (%p2527_p13), %s568_s20, 512  }
  0x73   : > { %2297 = vsyncadd (%p2527_p13), %s568_s20, 4294966784  ;;  %s2703_s12 = scalar_lea.vmem [#allocation11], %s1695_s9  ;;  %s588_s28 = scalar_lea.sflag [#allocation13], %s548_s10 }
  0x74   : > { %s2705_s25 = scalar_lea.vmem [#allocation12], %s1695_s9 }
  0x75   : > { %2299 = dma.done.wait (%p2527_p13), %s588_s28, 1280  }
  0x76   : > { %2301 = vsyncadd (%p2527_p13), %s588_s28, 4294966016  ;;  %s1699_s5 = sshll.u32 %s559_s13, 6  ;;  %s608_s1 = scalar_lea.sflag [#allocation16], %s559_s13 }
  0x77   : > { %s2711_s24 = scalar_lea.vmem [#allocation14], %s1699_s5  ;;  %s2713_s16 = scalar_lea.vmem [#allocation15], %s1699_s5 }
  0x78   : > { %2303 = dma.done.wait (%p2527_p13), %s608_s1, 1024  }
  0x79   : > { %2305 = vsyncadd (%p2527_p13), %s608_s1, 4294966272  ;;  %s2960_s14 = sld [smem:[#allocation29_spill]]  ;;  %s2733_s5 = scalar_lea.vmem [#allocation17], %s1694_s3 }
  0x7a   : > { %s2961_s29 = sld [smem:[#allocation43_spill]] }
  0x7b   : > { %s2962_s20 = sld [smem:[#allocation44_spill]] }
  0x7f   : > { %p689_p7 = scmp.lt.s32.totalorder %s2960_s14, 1  ;;  %p1702_p11 = scmp.ne.s32.totalorder %s2960_s14, 0 }
  0x81   : > { %s2721_s7 = scalar_select %p689_p7, %s2960_s14, 1 }
  0x82   : > { %699 = sbr.rel (%p1702_p11) target bundleno = 137 (0x89), region = 96 }
  0x83   : > { %s691_s26 = scalar_lea.vmem %s2961_s29, %s2721_s7  ;;  %s694_s28 = scalar_lea.vmem %s2962_s20, %s2721_s7 }
  0x87   : > { %v700_v0 = vld [vmem:[%s2678_s11] sm:$0xff] }
  0x88   : > { %701 = vst [vmem:[#allocation2] sm:$0xff] %v700_v0 }
  0x89 PF: > { %v709_v1 = vld [vmem:[%s2691_s15] sm:$0xf]  ;;  %v710_v2 = vld [vmem:[%s2691_s15 + $0x4] sm:$0xf]  ;;  %v711_v6 = vld [vmem:[%s2691_s15 + $0x8] sm:$0xf] }
  0x8a   : > { %v713_v3 = vld [vmem:[%s2697_s23] sm:$0xf]  ;;  %732 = vmatpush.bf16.xpose.msra.mxu2 %v709_v1  ;;  %745 = vmatpush.bf16.xpose.msra.mxu3 %v710_v2  ;;  %v714_v4 = vld [vmem:[%s2697_s23 + $0x4] sm:$0xf]  ;;  %v712_v7 = vld [vmem:[%s2691_s15 + $0xc] sm:$0xf] }
  0x8b   : > { %788 = vmatpush.bf16.xpose.msra.mxu0 %v713_v3  ;;  %801 = vmatpush.bf16.xpose.msra.mxu1 %v714_v4  ;;  %v715_v9 = vld [vmem:[%s2697_s23 + $0x8] sm:$0xf]  ;;  %v716_v10 = vld [vmem:[%s2697_s23 + $0xc] sm:$0xf]  ;;  %v717_v11 = vld [vmem:[%s2703_s12] sm:$0xf] }
  0x8c   : > { %v718_v12 = vld [vmem:[%s2703_s12 + $0x4] sm:$0xf]  ;;  %v719_v13 = vld [vmem:[%s2703_s12 + $0x8] sm:$0xf]  ;;  %v720_v14 = vld [vmem:[%s2703_s12 + $0xc] sm:$0xf] }
  0x8d   : > { %vm893_vm0 = vcmask 64512   ;;  %vm1034_vm1 = vcmask 1043456   ;;  %v974_v51 = vld [vmem:[%s551_s27] sm:$0x1]  ;;  %v2356_v55 = vmov 0   ;;  %s2967_s12 = sld [smem:[#allocation29_spill]] }
  0x8e   : > { %vm975_vm2 = vcmp.gt.f32.partialorder %v974_v51, 0.5 }
  0x8f   : > { %v2741_v5 = vld [vmem:[#allocation2] sm:$0xff]  ;;  %v976_v56 = vsel %vm975_vm2, 1, %v2356_v55 }
  0x90   : > { %v708_v8 = vpack.c.bf16 %v2741_v5, %v2741_v5  ;;  %v977_v59 = vperm.slane %v976_v56, 0 }
  0x92   : > { %758 = vmatpush.bf16.xpose.msrb.mxu2 %v711_v6  ;;  %771 = vmatpush.bf16.xpose.msrb.mxu3 %v712_v7  ;;  %vm2767_vm3 = vcmp.eq.s32.totalorder %v977_v59, 1  ;;  %v722_v59 = vld [vmem:[%s2705_s25 + $0x4] sm:$0xf] }
  0x93   : > { %733 = vmatmul.bf16.vlgmr.msra.gmra.mxu2 %v708_v8  ;;  %746 = vmatmul.bf16.vlgmr.msra.gmra.mxu3 %v708_v8  ;;  %p1780_p12 = scmp.ne.s32.totalorder %s2967_s12, 1 }
  0x94   : > { %789 = vmatmul.bf16.vlgmr.msra.gmra.mxu0 %v708_v8  ;;  %802 = vmatmul.bf16.vlgmr.msra.gmra.mxu1 %v708_v8 }
  0x95   : > { %844 = vmatpush.bf16.xpose.msrb.mxu0 %v717_v11  ;;  %857 = vmatpush.bf16.xpose.msrb.mxu1 %v718_v12 }
  0x9a   : > { %814 = vmatpush.bf16.xpose.msra.mxu2 %v715_v9  ;;  %827 = vmatpush.bf16.xpose.msra.mxu3 %v716_v10 }
  0xa3   : > { %759 = vmatmul.bf16.vlgmr.msrb.gmra.mxu2 %v708_v8  ;;  %772 = vmatmul.bf16.vlgmr.msrb.gmra.mxu3 %v708_v8 }
  0xa4   : > { %845 = vmatmul.bf16.vlgmr.msrb.gmra.mxu0 %v708_v8  ;;  %858 = vmatmul.bf16.vlgmr.msrb.gmra.mxu1 %v708_v8 }
  0xa5   : > { %870 = vmatpush.bf16.xpose.msrb.mxu2 %v719_v13  ;;  %883 = vmatpush.bf16.xpose.msrb.mxu3 %v720_v14 }
  0xb3   : > { %815 = vmatmul.bf16.vlgmr.msra.gmra.mxu2 %v708_v8  ;;  %828 = vmatmul.bf16.vlgmr.msra.gmra.mxu3 %v708_v8 }
  0xc3   : > { %871 = vmatmul.bf16.vlgmr.msrb.gmra.mxu2 %v708_v8  ;;  %884 = vmatmul.bf16.vlgmr.msrb.gmra.mxu3 %v708_v8 }
 0x111   : > { %v790_v15 = vpop.f32.mrf.mxu0  ;;  %v803_v16 = vpop.f32.mrf.mxu1 }
 0x112   : > { %v833_v17 = vpack.c.bf16 %v790_v15, %v790_v15  ;;  %v834_v18 = vpack.c.bf16 %v803_v16, %v803_v16 }
 0x114   : > { %v898_v19 = vsel %vm893_vm0, %v833_v17, 0  ;;  %v917_v20 = vsel %vm893_vm0, %v834_v18, 0 }
 0x115   : > { %907 = vmatpush.bf16.xpose.msra.mxu0 %v898_v19  ;;  %926 = vmatpush.bf16.xpose.msra.mxu1 %v917_v20 }
 0x116   : > { %v734_v21 = vpop.f32.mrf.mxu2  ;;  %v747_v22 = vpop.f32.mrf.mxu3 }
 0x117   : > { %v778_v23 = vpack.c.bf16 %v747_v22, %v747_v22  ;;  %v777_v26 = vpack.c.bf16 %v734_v21, %v734_v21 }
 0x119   : > { %v792_v24 = vpop.f32.mrf.mxu0  ;;  %v805_v25 = vpop.f32.mrf.mxu1 }
 0x11c   : > { %1704 = vmatmul.msk.bf16.vlgmr.msra.gmra.mxu0 %vm893_vm0, %v777_v26  ;;  %1705 = vmatmul.msk.bf16.vlgmr.msra.gmra.mxu1 %vm893_vm0, %v778_v23 }
 0x11e   : > { %v736_v27 = vpop.f32.mrf.mxu2  ;;  %v749_v28 = vpop.f32.mrf.mxu3 }
 0x121   : > { %v846_v29 = vpop.f32.mrf.mxu0  ;;  %v859_v30 = vpop.f32.mrf.mxu1 }
 0x122   : > { %v889_v31 = vpack.c.bf16 %v846_v29, %v846_v29  ;;  %v890_v32 = vpack.c.bf16 %v859_v30, %v859_v30 }
 0x124   : > { %v1036_v33 = vsel %vm1034_vm1, %v889_v31, 0  ;;  %v1055_v34 = vsel %vm1034_vm1, %v890_v32, 0 }
 0x125   : > { %1045 = vmatpush.bf16.msrb.mxu0 %v1036_v33  ;;  %1064 = vmatpush.bf16.msrb.mxu1 %v1055_v34 }
 0x126   : > { %v760_v35 = vpop.f32.mrf.mxu2  ;;  %v773_v36 = vpop.f32.mrf.mxu3 }
 0x127   : > { %v779_v49 = vpack.c.bf16 %v760_v35, %v760_v35  ;;  %v780_v50 = vpack.c.bf16 %v773_v36, %v773_v36 }
 0x129   : > { %v848_v37 = vpop.f32.mrf.mxu0  ;;  %v861_v38 = vpop.f32.mrf.mxu1 }
 0x12e   : > { %v762_v39 = vpop.f32.mrf.mxu2  ;;  %v775_v40 = vpop.f32.mrf.mxu3 }
 0x136   : > { %v816_v41 = vpop.f32.mrf.mxu2  ;;  %v829_v42 = vpop.f32.mrf.mxu3 }
 0x137   : > { %v835_v43 = vpack.c.bf16 %v816_v41, %v816_v41  ;;  %v836_v44 = vpack.c.bf16 %v829_v42, %v829_v42 }
 0x139   : > { %v936_v45 = vsel %vm893_vm0, %v835_v43, 0  ;;  %v955_v46 = vsel %vm893_vm0, %v836_v44, 0 }
 0x13a   : > { %945 = vmatpush.bf16.xpose.msra.mxu2 %v936_v45  ;;  %964 = vmatpush.bf16.xpose.msra.mxu3 %v955_v46 }
 0x13e   : > { %v818_v47 = vpop.f32.mrf.mxu2  ;;  %v831_v48 = vpop.f32.mrf.mxu3 }
 0x141   : > { %1706 = vmatmul.msk.bf16.vlgmr.msra.gmra.mxu2 %vm893_vm0, %v779_v49  ;;  %1707 = vmatmul.msk.bf16.vlgmr.msra.gmra.mxu3 %vm893_vm0, %v780_v50 }
 0x146   : > { %v872_v52 = vpop.f32.mrf.mxu2  ;;  %v885_v57 = vpop.f32.mrf.mxu3 }
 0x147   : > { %v891_v53 = vpack.c.bf16 %v872_v52, %v872_v52  ;;  %v892_v58 = vpack.c.bf16 %v885_v57, %v885_v57  ;;  %v721_v57 = vld [vmem:[%s2705_s25] sm:$0xf] }
 0x149   : > { %v1074_v54 = vsel %vm1034_vm1, %v891_v53, 0  ;;  %v1093_v60 = vsel %vm1034_vm1, %v892_v58, 0  ;;  %v1116_v58 = vsel %vm1034_vm1, %v721_v57, 0 }
 0x14a   : > { %1083 = vmatpush.bf16.msrb.mxu2 %v1074_v54  ;;  %1102 = vmatpush.bf16.msrb.mxu3 %v1093_v60  ;;  %v1135_v60 = vsel %vm1034_vm1, %v722_v59, 0 }
 0x14b   : > { %1125 = vmatpush.bf16.msra.mxu0 %v1116_v58  ;;  %1144 = vmatpush.bf16.msra.mxu1 %v1135_v60  ;;  %v1800_v60 = vld [vmem:[%s2713_s16 + $0x8] sm:$0xff] }
 0x14e   : > { %v874_v61 = vpop.f32.mrf.mxu2  ;;  %v887_v2 = vpop.f32.mrf.mxu3 }
 0x199   : > { %v909_v62 = vpop.f32.mrf.mxu0  ;;  %v928_v63 = vpop.f32.mrf.mxu1 }
 0x19a   : > { %v970_v1 = vmul.f32 0.35355338, %v909_v62  ;;  %v971_v6 = vmul.f32 0.35355338, %v928_v63 }
 0x19c   : > { %v979_v3 = vsel %vm2767_vm3, -1e+09, %v970_v1  ;;  %v980_v9 = vsel %vm2767_vm3, -1e+09, %v971_v6  ;;  %v724_v6 = vld [vmem:[%s2705_s25 + $0xc] sm:$0xf] }
 0x19d   : > { %v983_v4 = vsel %vm893_vm0, %v979_v3, -inf  ;;  %v986_v10 = vsel %vm893_vm0, %v980_v9, -inf }
 0x19e   : > { %984 = vmax.xlane.f32.xlu1 %v983_v4 }
 0x1a1   : > { %v911_v7 = vpop.f32.mrf.mxu0  ;;  %v930_v8 = vpop.f32.mrf.mxu1 }
 0x1a2   : > { %v1173_v7 = vsel %vm1034_vm1, %v724_v6, 0 }
 0x1a3   : > { %1182 = vmatpush.bf16.msra.mxu3 %v1173_v7 }
 0x1a6   : > { %987 = vmax.xlane.f32.xlu1 %v986_v10 }
 0x1c4   : > { %v947_v11 = vpop.f32.mrf.mxu2  ;;  %v966_v12 = vpop.f32.mrf.mxu3 }
 0x1c5   : > { %v972_v13 = vmul.f32 0.35355338, %v947_v11  ;;  %v973_v16 = vmul.f32 0.35355338, %v966_v12 }
 0x1c7   : > { %v981_v14 = vsel %vm2767_vm3, -1e+09, %v972_v13  ;;  %v982_v19 = vsel %vm2767_vm3, -1e+09, %v973_v16 }
 0x1c8   : > { %v989_v15 = vsel %vm893_vm0, %v981_v14, -inf  ;;  %v992_v20 = vsel %vm893_vm0, %v982_v19, -inf }
 0x1c9   : > { %990 = vmax.xlane.f32.xlu0 %v989_v15 }
 0x1cc   : > { %v949_v17 = vpop.f32.mrf.mxu2  ;;  %v968_v18 = vpop.f32.mrf.mxu3 }
 0x1d1   : > { %993 = vmax.xlane.f32.xlu0 %v992_v20 }
 0x211   : > { %v985_v21 = vpop.xlane.xlu1 %984 }
 0x212   : > { %v995_v22 = vsub.f32 %v979_v3, %v985_v21  ;;  %v723_v3 = vld [vmem:[%s2705_s25 + $0x8] sm:$0xf] }
 0x213   : > { %v1154_v4 = vsel %vm1034_vm1, %v723_v3, 0 }
 0x214   : > { %v999_v23 = vmul.f32 1.442695, %v995_v22  ;;  %1163 = vmatpush.bf16.msra.mxu2 %v1154_v4  ;;  %v1949_v4 = vld [vmem:[%s694_s28] ss:$0 sm:$0xff] }
 0x216   : > { %1950 = vpow2.f32 %v999_v23 }
 0x219   : > { %v988_v24 = vpop.xlane.xlu1 %987 }
 0x21a   : > { %v996_v25 = vsub.f32 %v980_v9, %v988_v24 }
 0x21c   : > { %v1951_v26 = vpop.eup %1950  ;;  %v1001_v27 = vmul.f32 1.442695, %v996_v25 }
 0x21d   : > { %v1007_v28 = vsel %vm893_vm0, %v1951_v26, 0.0 }
 0x21e   : > { %1952 = vpow2.f32 %v1001_v27  ;;  %1008 = vadd.xlane.f32.xlu0 %v1007_v28  ;;  %v1797_v27 = vld [vmem:[%s2711_s24 + $0x30] sm:$0xff]  ;;  %v703_v28 = vlaneseq }
 0x224   : > { %v1953_v29 = vpop.eup %1952 }
 0x225   : > { %v1010_v30 = vsel %vm893_vm0, %v1953_v29, 0.0 }
 0x226   : > { %1011 = vadd.xlane.f32.xlu1 %v1010_v30 }
 0x23c   : > { %v991_v31 = vpop.xlane.xlu0 %990 }
 0x23d   : > { %v997_v32 = vsub.f32 %v981_v14, %v991_v31 }
 0x23f   : > { %v1003_v33 = vmul.f32 1.442695, %v997_v32  ;;  %v2357_v32 = vmov 0.0  }
 0x241   : > { %1954 = vpow2.f32 %v1003_v33 }
 0x244   : > { %v994_v34 = vpop.xlane.xlu0 %993 }
 0x245   : > { %v998_v35 = vsub.f32 %v982_v19, %v994_v34 }
 0x247   : > { %v1955_v36 = vpop.eup %1954  ;;  %v1005_v37 = vmul.f32 1.442695, %v998_v35 }
 0x248   : > { %v1013_v38 = vsel %vm893_vm0, %v1955_v36, 0.0 }
 0x249   : > { %1956 = vpow2.f32 %v1005_v37  ;;  %1014 = vadd.xlane.f32.xlu2 %v1013_v38  ;;  %v1795_v37 = vld [vmem:[%s2711_s24 + $0x20] sm:$0xff]  ;;  %v1794_v38 = vld [vmem:[%s2711_s24 + $0x18] sm:$0xff] }
 0x24f   : > { %v1957_v39 = vpop.eup %1956 }
 0x250   : > { %v1016_v40 = vsel %vm893_vm0, %v1957_v39, 0.0 }
 0x251   : > { %1017 = vadd.xlane.f32.xlu2 %v1016_v40  ;;  %v1792_v40 = vld [vmem:[%s2711_s24 + $0x8] sm:$0xff] }
 0x291   : > { %v1009_v41 = vpop.xlane.xlu0 %1008 }
 0x292   : > { %1958 = vrcp.f32 %v1009_v41  ;;  %v1791_v41 = vld [vmem:[%s2711_s24] sm:$0xff] }
 0x298   : > { %v1959_v42 = vpop.eup %1958 }
 0x299   : > { %v1023_v43 = vmul.f32 %v1959_v42, %v1951_v26  ;;  %v1012_v44 = vpop.xlane.xlu1 %1011  ;;  %v1798_v26 = vld [vmem:[%s2711_s24 + $0x38] sm:$0xff] }
 0x29a   : > { %1960 = vrcp.f32 %v1012_v44  ;;  %v1806_v42 = vld [vmem:[%s2713_s16 + $0x38] sm:$0xff] }
 0x29b   : > { %v1027_v45 = vpack.c.bf16 %v1023_v43, %v1023_v43  ;;  %v1805_v43 = vld [vmem:[%s2713_s16 + $0x30] sm:$0xff] }
 0x29d   : > { %1708 = vmatmul.msk.bf16.vlgmr.msrb.gmra.mxu0 %vm893_vm0, %v1027_v45 }
 0x29e   : > { %1282 = vmatpush.bf16.msrb.mxu0 %v1798_v26 }
 0x2a0   : > { %v1961_v46 = vpop.eup %1960 }
 0x2a1   : > { %v1024_v47 = vmul.f32 %v1961_v46, %v1953_v29  ;;  %v704_v29 = vand.u32 127, %v703_v28  ;;  %v1804_v46 = vld [vmem:[%s2713_s16 + $0x28] sm:$0xff] }
 0x2a2   : > { %1283 = vmatpush.bf16.msrb.mxu0 %v1797_v27 }
 0x2a3   : > { %v1028_v48 = vpack.c.bf16 %v1024_v47, %v1024_v47  ;;  %vm705_vm4 = vcmp.lt.s32.totalorder %v704_v29, 32 }
 0x2a4   : > { %v2806_v33 = vsel %vm705_vm4, 1.0, %v2357_v32 }
 0x2a5   : > { %1709 = vmatmul.msk.bf16.vlgmr.msrb.gmra.mxu1 %vm893_vm0, %v1028_v48  ;;  %v1803_v48 = vld [vmem:[%s2713_s16 + $0x20] sm:$0xff] }
 0x2a6   : > { %1365 = vmatpush.bf16.msrb.mxu1 %v1806_v42 }
 0x2aa   : > { %1366 = vmatpush.bf16.msrb.mxu1 %v1805_v43 }
 0x2ae   : > { %1367 = vmatpush.bf16.msrb.mxu1 %v1804_v46 }
 0x2b2   : > { %1368 = vmatpush.bf16.msrb.mxu1 %v1803_v48 }
 0x2bc   : > { %v1015_v49 = vpop.xlane.xlu2 %1014 }
 0x2bd   : > { %1962 = vrcp.f32 %v1015_v49  ;;  %v1802_v49 = vld [vmem:[%s2713_s16 + $0x18] sm:$0xff] }
 0x2be   : > { %1369 = vmatpush.bf16.msrb.mxu1 %v1802_v49 }
 0x2c3   : > { %v1963_v50 = vpop.eup %1962 }
 0x2c4   : > { %v1025_v51 = vmul.f32 %v1963_v50, %v1955_v36  ;;  %v1018_v52 = vpop.xlane.xlu2 %1017  ;;  %v1796_v36 = vld [vmem:[%s2711_s24 + $0x28] sm:$0xff] }
 0x2c5   : > { %1964 = vrcp.f32 %v1018_v52  ;;  %1284 = vmatpush.bf16.msrb.mxu0 %v1796_v36  ;;  %v1801_v52 = vld [vmem:[%s2713_s16 + $0x10] sm:$0xff] }
 0x2c6   : > { %v1029_v53 = vpack.c.bf16 %v1025_v51, %v1025_v51  ;;  %1370 = vmatpush.bf16.msrb.mxu1 %v1801_v52 }
 0x2c8   : > { %1710 = vmatmul.msk.bf16.vlgmr.msrb.gmra.mxu2 %vm893_vm0, %v1029_v53 }
 0x2c9   : > { %1285 = vmatpush.bf16.msrb.mxu0 %v1795_v37 }
 0x2ca   : > { %1371 = vmatpush.bf16.msrb.mxu1 %v1800_v60 }
 0x2cb   : > { %v1965_v54 = vpop.eup %1964 }
 0x2cc   : > { %v1026_v55 = vmul.f32 %v1965_v54, %v1957_v39  ;;  %v1793_v39 = vld [vmem:[%s2711_s24 + $0x10] sm:$0xff] }
 0x2cd   : > { %1286 = vmatpush.bf16.msrb.mxu0 %v1794_v38 }
 0x2ce   : > { %v1030_v56 = vpack.c.bf16 %v1026_v55, %v1026_v55 }
 0x2d0   : > { %1711 = vmatmul.msk.bf16.vlgmr.msrb.gmra.mxu3 %vm893_vm0, %v1030_v56 }
 0x2d1   : > { %1287 = vmatpush.bf16.msrb.mxu0 %v1793_v39 }
 0x2d5   : > { %1288 = vmatpush.bf16.msrb.mxu0 %v1792_v40 }
 0x2d9   : > { %1289 = vmatpush.bf16.msrb.mxu0 %v1791_v41 }
 0x31a   : > { %v1047_v61 = vpop.f32.mrf.mxu0 }
 0x31b   : > { %v1108_v62 = vpack.c.bf16 %v1047_v61, %v1047_v61  ;;  %v1799_v61 = vld [vmem:[%s2713_s16] sm:$0xff] }
 0x31c   : > { %1372 = vmatpush.bf16.msrb.mxu1 %v1799_v61 }
 0x31d   : > { %1712 = vmatmul.msk.bf16.vlgmr.msra.gmra.mxu0 %vm893_vm0, %v1108_v62  ;;  %v1948_v62 = vld [vmem:[%s691_s26] ss:$0 sm:$0xff] }
 0x322   : > { %v1049_v63 = vpop.f32.mrf.mxu0  ;;  %v1066_v0 = vpop.f32.mrf.mxu1 }
 0x323   : > { %v1109_v1 = vpack.c.bf16 %v1066_v0, %v1066_v0 }
 0x325   : > { %1713 = vmatmul.msk.bf16.vlgmr.msra.gmra.mxu1 %vm893_vm0, %v1109_v1 }
 0x32a   : > { %v1068_v2 = vpop.f32.mrf.mxu1 }
 0x34b   : > { %v1085_v8 = vpop.f32.mrf.mxu2 }
 0x34c   : > { %v1110_v9 = vpack.c.bf16 %v1085_v8, %v1085_v8 }
 0x34e   : > { %1714 = vmatmul.msk.bf16.vlgmr.msra.gmra.mxu2 %vm893_vm0, %v1110_v9 }
 0x353   : > { %v1087_v10 = vpop.f32.mrf.mxu2  ;;  %v1104_v11 = vpop.f32.mrf.mxu3 }
 0x354   : > { %v1111_v12 = vpack.c.bf16 %v1104_v11, %v1104_v11 }
 0x356   : > { %1715 = vmatmul.msk.bf16.vlgmr.msra.gmra.mxu3 %vm893_vm0, %v1111_v12 }
 0x35b   : > { %v1106_v13 = vpop.f32.mrf.mxu3 }
 0x39a   : > { %v1127_v14 = vpop.f32.mrf.mxu0 }
 0x3a2   : > { %v1129_v15 = vpop.f32.mrf.mxu0  ;;  %v1146_v16 = vpop.f32.mrf.mxu1 }
 0x3a3   : > { %v1188_v19 = vadd.f32 %v1146_v16, %v1127_v14 }
 0x3aa   : > { %v1148_v17 = vpop.f32.mrf.mxu1 }
 0x3d1   : > { %v1165_v18 = vpop.f32.mrf.mxu2 }
 0x3d2   : > { %v1189_v20 = vadd.f32 %v1188_v19, %v1165_v18 }
 0x3d9   : > { %v1167_v21 = vpop.f32.mrf.mxu2  ;;  %v1184_v22 = vpop.f32.mrf.mxu3 }
 0x3da   : > { %v1190_v23 = vadd.f32 %v1189_v20, %v1184_v22 }
 0x3dc   : > { %v1191_v24 = vadd.f32 %v1190_v23, %v2741_v5 }
 0x3de   : > { %1192 = vadd.xlane.f32.xlu2 %v1191_v24 }
 0x3e1   : > { %v1186_v25 = vpop.f32.mrf.mxu3 }
 0x451   : > { %v1193_v30 = vpop.xlane.xlu2 %1192 }
 0x452   : > { %v1194_v31 = vmul.f32 0.03125, %v1193_v30 }
 0x454   : > { %v1195_v5 = vsub.f32 %v1191_v24, %v1194_v31 }
 0x456   : > { %v1196_v34 = vmul.f32 %v2806_v33, %v1195_v5 }
 0x458   : > { %v1197_v35 = vmul.f32 %v1196_v34, %v1196_v34 }
 0x45a   : > { %1198 = vadd.xlane.f32.xlu0 %v1197_v35 }
 0x4cd   : > { %v1199_v44 = vpop.xlane.xlu0 %1198 }
 0x4ce   : > { %v1200_v45 = vmul.f32 0.03125, %v1199_v44 }
 0x4d0   : > { %v1201_v47 = vadd.f32 1e-05, %v1200_v45 }
 0x4d2   : > { %1966 = vrsqrt.f32 %v1201_v47  ;;  %vm1208_vm6 = vweird.f32 %v1201_v47 }
 0x4d8   : > { %v1967_v50 = vpop.eup %1966 }
 0x4d9   : > { %v1203_v51 = vmul.f32 %v1967_v50, %v1201_v47  ;;  %vm1209_vm5 = vweird.f32 %v1967_v50 }
 0x4da   : > { %vm1210_vm7 = vmor %vm1208_vm6, %vm1209_vm5 }
 0x4db   : > { %v1204_v53 = vmul.f32 %v1967_v50, %v1203_v51 }
 0x4dd   : > { %v1205_v54 = vmul.f32 0.5, %v1204_v53 }
 0x4df   : > { %v1206_v55 = vsub.f32 1.5, %v1205_v54 }
 0x4e1   : > { %v1207_v56 = vmul.f32 %v1967_v50, %v1206_v55 }
 0x4e3   : > { %v1211_v57 = vsel %vm1210_vm7, %v1967_v50, %v1207_v56 }
 0x4e4   : > { %v1212_v58 = vmul.f32 %v1211_v57, %v1196_v34 }
 0x4e6   : > { %v1213_v59 = vpack.c.bf16 %v1212_v58, %v1212_v58 }
 0x4e8   : > { %1290 = vmatmul.bf16.vlgmr.msrb.gmra.mxu0 %v1213_v59 }
 0x565   : > { %v1291_v63 = vpop.f32.mrf.mxu0 }
 0x566   : > { %v1292_v0 = vadd.f32 %v1948_v62, %v1291_v63 }
 0x568   : > { %v1295_v1 = vmax.f32 %v1292_v0, 0.0 }
 0x56a   : > { %v1296_v2 = vpack.c.bf16 %v1295_v1, %v1295_v1 }
 0x56c   : > { %1373 = vmatmul.bf16.vlgmr.msrb.gmra.mxu1 %v1296_v2 }
 0x56d   : > { %v1293_v3 = vpop.f32.mrf.mxu0 }
 0x5e9   : > { %v1374_v6 = vpop.f32.mrf.mxu1 }
 0x5ea   : > { %v1375_v7 = vadd.f32 %v1949_v4, %v1374_v6 }
 0x5ec   : > { %v1378_v8 = vadd.f32 %v1375_v7, %v1212_v58 }
 0x5ee   : > { %1379 = vadd.xlane.f32.xlu1 %v1378_v8 }
 0x5f1   : > { %v1376_v9 = vpop.f32.mrf.mxu1 }
 0x661   : > { %v1380_v10 = vpop.xlane.xlu1 %1379 }
 0x662   : > { %v1381_v11 = vmul.f32 0.03125, %v1380_v10 }
 0x664   : > { %v1382_v12 = vsub.f32 %v1378_v8, %v1381_v11 }
 0x666   : > { %v1383_v13 = vmul.f32 %v2806_v33, %v1382_v12 }
 0x668   : > { %v1384_v14 = vmul.f32 %v1383_v13, %v1383_v13 }
 0x66a   : > { %1385 = vadd.xlane.f32.xlu2 %v1384_v14 }
 0x6dd   : > { %v1386_v15 = vpop.xlane.xlu2 %1385 }
 0x6de   : > { %v1387_v16 = vmul.f32 0.03125, %v1386_v15 }
 0x6e0   : > { %v1388_v17 = vadd.f32 1e-05, %v1387_v16 }
 0x6e2   : > { %1968 = vrsqrt.f32 %v1388_v17  ;;  %vm1395_vm9 = vweird.f32 %v1388_v17 }
 0x6e8   : > { %v1969_v18 = vpop.eup %1968 }
 0x6e9   : > { %v1390_v19 = vmul.f32 %v1969_v18, %v1388_v17  ;;  %vm1396_vm8 = vweird.f32 %v1969_v18 }
 0x6ea   : > { %vm1397_vm10 = vmor %vm1395_vm9, %vm1396_vm8 }
 0x6eb   : > { %v1391_v20 = vmul.f32 %v1969_v18, %v1390_v19 }
 0x6ed   : > { %v1392_v21 = vmul.f32 0.5, %v1391_v20 }
 0x6ef   : > { %v1393_v22 = vsub.f32 1.5, %v1392_v21 }
 0x6f1   : > { %v1394_v23 = vmul.f32 %v1969_v18, %v1393_v22 }
 0x6f2   : > { %1404 = sbr.rel (%p1780_p12) target bundleno = 1784 (0x6f8), region = 100 }
 0x6f3   : > { %v1398_v24 = vsel %vm1397_vm10, %v1969_v18, %v1394_v23 }
 0x6f4   : > { %v1399_v25 = vmul.f32 %v1398_v24, %v1383_v13 }
 0x6f6   : > { %1400 = vst [vmem:[#allocation2] sm:$0xff] %v1399_v25 }
 0x6f7   : > { %1405 = vst [vmem:[%s2733_s5] sm:$0xff] %v1399_v25 }
 0x6f8 PF: > { %s2968_s25 = sld [smem:[#allocation30_spill]]  ;;  %s1419_s10 = sshll.u32 %s2733_s5, 4  ;;  %s1420_s10 = int_to_ptr.vmem [resolvable:$true] %s1419_s10 }
 0x6f9   : > { %s2970_s7 = sld [smem:[#allocation45_spill]]  ;;  %s1407_s26 = scalar_lea.sflag [#allocation5], %s2672_s30 }
 0x6fe   : > { %s1782_s1 = sshll.u32 %s2968_s25, 3 }
 0x6ff   : > { %s1417_s19 = scalar_lea.hbm %s2970_s7, %s1782_s1  ;;  %s2230_s3 = scalar_lea.hbm %s2970_s7, 16 }
 0x700   : > { %s1421_s29 = sshll.u32 %s1417_s19, 4  ;;  %s1422_s29 = int_to_ptr.hbm [resolvable:$true] %s1421_s29 }
 0x701   : > { %s2224_s13 = sshra.s32 %s1422_s29, 4  ;;  %s2225_s13 = int_to_ptr.hbm [resolvable:$true] %s2224_s13 }
 0x702   : > { %s2226_s9 = scalar_lea.hbm %s2225_s13, 8  ;;  %p2231_p2 = scmp.lt.s32.totalorder %s2225_s13, %s2970_s7 }
 0x703   : > { %p2227_p13 = scmp.ne.s32.totalorder %s2225_s13, %s2226_s9  ;;  %p2232_p6 = scmp.lt.s32.totalorder %s2230_s3, %s2226_s9 }
 0x705   : > { %p2228_p0 = pnand %p2227_p13, %p2536_p8  ;;  %p2233_p1 = por %p2232_p6, %p2231_p2 }
 0x707   : > { %p2229_p5 = pneg %p2228_p0 }
 0x709   : > { %p2234_p3 = pnand %p2233_p1, %p2229_p5 }
 0x70b   : > { %2237 = shalt.err (!%p2234_p3)
}
 0x70c   : > { %1823 = dma.vmem_to_hbm [thread:$0]  (%p2536_p8), %s1420_s10, 128, %s1422_s29, %s1407_s26  }
 0x70d PF: > { %s2971_s30 = sld [smem:[#allocation31_spill]] }
 0x70e   : > { %s2972_s5 = sld [smem:[#allocation27_spill]] }
 0x713   : > { %p1855_p10 = scmp.ge.s32.totalorder %s2971_s30, 2 }
 0x714   : > { %s1433_s15 = sand.u32 1, %s2972_s5  }
 0x715   : > { %p1851_p4 = pnand %p1855_p10, %p2543_p9  ;;  %s1434_s23 = scalar_lea.sflag [#allocation5], %s1433_s15 }
 0x717   : > { %p1852_p7 = pneg %p1851_p4 }
 0x719   : > { %2307 = dma.done.wait (%p1852_p7), %s1434_s23, 128  }
 0x71a   : > { %2309 = vsyncadd (%p1852_p7), %s1434_s23, 4294967168  ;;  %s38_s23 = sadd.s32 1, %s2971_s30   ;;  %s2974_s13 = sld [smem:[#allocation25_spill]] }
 0x71b   : > { %p35_p11 = scmp.ge.s32.totalorder %s38_s23, 6   ;;  %s2975_s14 = sld [smem:[#allocation26_spill]] }
 0x71c   : > { %s2976_s15 = sld [smem:[#allocation35_spill]]  ;;  %s2981_s16 = smov %s2328_s17 }
 0x71d   : > { %s2977_s12 = sld [smem:[#allocation28_spill]]  ;;  %s2983_s19 = smov %s2344_s21 }
 0x71e   : > { %s2978_s18 = sld [smem:[#allocation36_spill]]  ;;  %s2984_s20 = smov %s2348_s22 }
 0x71f   : > { %s2979_s25 = sld [smem:[#allocation33_spill]] }
 0x720   : > { %s2980_s24 = sld [smem:[#allocation34_spill]] }
 0x722   :  { %37 = sbr.rel (!%p35_p11) target bundleno = 24 (0x18), region = 204 }
 0x723   : > { %s2982_s17 = smov %s2977_s12 }
 0x725   : > { %s2985_s21 = smov %s2979_s25 }
 0x726   : > { %s2986_s22 = smov %s2980_s24 }
 0x727   :  { %1440 = vsyncpa [#allocation4], 1 }
 0x728   :  { %1442 = vsyncpa [#allocation4 + $0x1], 1 }
 0x729   :  { %1443 = vsyncpa [#allocation7], 1 }
 0x72a   :  { %1445 = vsyncpa [#allocation7 + $0x1], 1 }
 0x72b   :  { %1446 = vsyncpa [#allocation10], 1 }
 0x72c   :  { %1448 = vsyncpa [#allocation10 + $0x1], 1 }
 0x72d   :  { %1449 = vsyncpa [#allocation13], 1 }
 0x72e   :  { %1451 = vsyncpa [#allocation13 + $0x1], 1 }
 0x72f   :  { %1452 = vsyncpa [#allocation16], 1 }
 0x730   :  { %1454 = vsyncpa [#allocation16 + $0x1], 1 }
 0x731   :  { %1455 = vsyncpa [#allocation5], 1 }
 0x732   :  { %1457 = vsyncpa [#allocation5 + $0x1], 1 }

</bundles_post_ra>
